<compile_context>
chip_gen: v6e
topology: v6e:2x2x1
jax: 0.10.0
libtpu: 0.0.40
codegen_flags: <defaults>
</compile_context>

<pallas_src>
import functools

import jax
import jax.numpy as jnp
from jax.experimental import pallas as pl
from jax.experimental.pallas import tpu as pltpu

_INV_SQRT2 = 0.7071067811865476


def _gelu(x, approximate):
    if approximate:
        # tanh approximation -> EUP (a separate VLIW slot), off the VPU critical slot.
        return jax.nn.gelu(x, approximate=True)
    # nn.GELU() default: 0.5 * x * (1 + erf(x / sqrt(2)))
    return 0.5 * x * (1.0 + jax.lax.erf(x * _INV_SQRT2))


def _layernorm_cols(x, gamma, beta, eps=1e-5):
    """LayerNorm over the feature axis (axis 0) of an (F, tokens) tile.

    Two-pass centered variance (matches PyTorch numerics; avoids the
    E[x^2] - mean^2 cancellation when |mean| >> std).
    """
    mu = jnp.mean(x, axis=0, keepdims=True)
    xc = x - mu
    var = jnp.mean(xc * xc, axis=0, keepdims=True)
    inv = jax.lax.rsqrt(var + eps)
    return xc * inv * gamma + beta


def _linear_ffn_kernel(x_ref, w1_ref, p1_ref, w2_ref, p2_ref, o_ref,
                       *, approximate_gelu):
    xb = x_ref[0]                                  # (C, tn): features x tokens (lanes)

    # Packed per-layer params: column 0 = bias, 1 = ln gamma, 2 = ln beta.
    b1, g1, be1 = p1_ref[:, 0:1], p1_ref[:, 1:2], p1_ref[:, 2:3]
    b2, g2, be2 = p2_ref[:, 0:1], p2_ref[:, 1:2], p2_ref[:, 2:3]

    # fc1_linear: (H, C) @ (C, tn) -> (H, tn), f32 MXU accumulation.
    h = jnp.dot(w1_ref[...], xb.astype(w1_ref.dtype),
                preferred_element_type=jnp.float32) + b1
    h = _gelu(_layernorm_cols(h, g1, be1), approximate_gelu)      # fc1_ln + act

    # fc2_linear: (O, H) @ (H, tn) -> (O, tn)
    z = jnp.dot(w2_ref[...], h.astype(w2_ref.dtype),
                preferred_element_type=jnp.float32) + b2
    z = _gelu(_layernorm_cols(z, g2, be2), approximate_gelu)      # fc2_ln + act

    o_ref[0] = z.astype(o_ref.dtype)                              # already (O, tn) layout


def _vmem_limit_bytes():
    """Generation-aware VMEM request with headroom for Mosaic scratch / DMA bookkeeping."""
    try:
        cap = int(pltpu.get_tpu_info().vmem_capacity_bytes)
    except Exception:
        cap = 64 * 1024 * 1024
    return max(32 * 1024 * 1024, min(cap - 16 * 1024 * 1024, 100 * 1024 * 1024))


def linear_ffn(x, params, *, tn_target=512, approximate_gelu=False,
               use_bf16_matmul=False):
    """x: (B, C, N) float32.  Returns (B, C_out, N).  Params in PyTorch layout."""
    B, C, N = x.shape
    w1, b1, g1, be1, w2, b2, g2, be2 = params
    H, C_in = w1.shape
    O, H_in = w2.shape
    assert C_in == C and H_in == H

    # --- lane density: fold batch into the token (lane) axis when N is short.
    # N < 128 would mean N/128 lane utilisation and masked partial stores on every
    # output vreg; one wrapper transpose buys full-width vregs instead.
    fold_batch = (N < 128) and (B > 1)
    if fold_batch:
        xk = jnp.transpose(x, (1, 0, 2)).reshape(1, C, B * N)
        Bk, T = 1, B * N
    else:
        xk, Bk, T = x, B, N

    # Token (lane) tile.  tn == T is exempt from the 128-divisibility rule; larger T
    # is padded to a multiple of the tile (zeros flow through LN/GELU harmlessly and
    # are sliced off below).
    if T <= tn_target:
        tn, Tp = T, T
    else:
        tn = tn_target
        Tp = pl.cdiv(T, tn) * tn
    xp = xk if Tp == T else jnp.pad(xk, ((0, 0), (0, 0), (0, Tp - T)))

    # Pack each layer's (bias, ln_gamma, ln_beta) into one (F, 3) operand: three
    # separate (F, 1) operands would each pad their lane dim to 128 in VMEM.
    p1 = jnp.stack([b1, g1, be1], axis=1).astype(jnp.float32)     # (H, 3)
    p2 = jnp.stack([b2, g2, be2], axis=1).astype(jnp.float32)     # (O, 3)

    # Optional bf16 MXU-input fast path (v6e/v7x); accumulation stays f32.
    wdt = jnp.bfloat16 if use_bf16_matmul else jnp.float32
    w1k = w1.astype(wdt)
    w2k = w2.astype(wdt)

    # v7x note: keep total grid (Bk * Tp/tn) >= 2 when possible so both TensorCores
    # get work under megacore sharding; degenerate only at tiny demo sizes.
    grid = (Bk, Tp // tn)
    const = lambda b, j: (0, 0)

    flops = 2 * Bk * Tp * (C * H + H * O)
    transcendentals = 2 * Bk * Tp * (H + O)                       # erf/tanh + rsqrt, rough
    bytes_accessed = (4 * Bk * Tp * (C + O)
                      + w1k.dtype.itemsize * C * H + w2k.dtype.itemsize * H * O
                      + 4 * 3 * (H + O))

    kernel = functools.partial(_linear_ffn_kernel, approximate_gelu=approximate_gelu)

    def call(resident_kwargs):
        in_specs = [
            pl.BlockSpec((1, C, tn), lambda b, j: (b, 0, j)),            # x tile
            pl.BlockSpec((H, C), const, **resident_kwargs),             # W1 (out, in)
            pl.BlockSpec((H, 3), const, **resident_kwargs),             # [b1 | g1 | be1]
            pl.BlockSpec((O, H), const, **resident_kwargs),             # W2 (out, in)
            pl.BlockSpec((O, 3), const, **resident_kwargs),             # [b2 | g2 | be2]
        ]
        return pl.pallas_call(
            kernel,
            out_shape=jax.ShapeDtypeStruct((Bk, O, Tp), jnp.float32),
            grid_spec=pltpu.PrefetchScalarGridSpec(
                num_scalar_prefetch=0,
                grid=grid,
                in_specs=in_specs,
                out_specs=pl.BlockSpec((1, O, tn), lambda b, j: (b, 0, j)),
            ),
            compiler_params=pltpu.CompilerParams(
                dimension_semantics=("parallel", "parallel"),
                vmem_limit_bytes=_vmem_limit_bytes()),
            cost_estimate=pl.CostEstimate(
                flops=flops, transcendentals=transcendentals,
                bytes_accessed=bytes_accessed),
        )(xp, w1k, p1, w2k, p2)

    try:
        # Constant-index blocks are never re-fetched: single-buffer them to halve
        # their resident VMEM footprint.
        out = call({"pipeline_mode": pl.Buffered(1)})
    except Exception:
        # Fallback for jax versions without BlockSpec(pipeline_mode=...): default
        # (double-buffered) constant blocks -- same numerics, slightly more VMEM.
        out = call({})

    if Tp != T:
        out = out[:, :, :T]
    if fold_batch:
        out = jnp.transpose(out.reshape(O, B, N), (1, 0, 2))
    return out


def init_params(key, in_features, hidden_features, out_features):
    """PyTorch-native layout: Linear weight (out, in), bias (out,); LN weight/bias 1-D."""
    k1, k2, k3, k4 = jax.random.split(key, 4)
    lim1 = 1.0 / jnp.sqrt(in_features)
    lim2 = 1.0 / jnp.sqrt(hidden_features)
    w1 = jax.random.uniform(k1, (hidden_features, in_features), jnp.float32, -lim1, lim1)
    b1 = jax.random.uniform(k2, (hidden_features,), jnp.float32, -lim1, lim1)
    w2 = jax.random.uniform(k3, (out_features, hidden_features), jnp.float32, -lim2, lim2)
    b2 = jax.random.uniform(k4, (out_features,), jnp.float32, -lim2, lim2)
    g1 = jnp.ones((hidden_features,), jnp.float32)
    be1 = jnp.zeros((hidden_features,), jnp.float32)
    g2 = jnp.ones((out_features,), jnp.float32)
    be2 = jnp.zeros((out_features,), jnp.float32)
    return (w1, b1, g1, be1, w2, b2, g2, be2)


def _layernorm_last(x, gamma, beta, eps=1e-5):
    mu = jnp.mean(x, axis=-1, keepdims=True)
    xc = x - mu
    var = jnp.mean(xc * xc, axis=-1, keepdims=True)
    return xc * jax.lax.rsqrt(var + eps) * gamma + beta


def linear_ffn_reference(x, params, *, approximate_gelu=False):
    """Pure-JAX reference mirroring the PyTorch forward (pre_norm=False, gelu)."""
    w1, b1, g1, be1, w2, b2, g2, be2 = params
    y = jnp.transpose(x, (0, 2, 1))                 # (B, N, C)
    y = y @ w1.T + b1
    y = _gelu(_layernorm_last(y, g1, be1), approximate_gelu)
    y = y @ w2.T + b2
    y = _gelu(_layernorm_last(y, g2, be2), approximate_gelu)
    return jnp.transpose(y, (0, 2, 1))              # (B, O, N)


if __name__ == "__main__":
    key = jax.random.PRNGKey(0)
    kx, kp = jax.random.split(key)

    B, C, N = 2, 16, 8          # (batch, in_features=channels, sequence)
    hidden, out_features = 32, 16

    x = jax.random.normal(kx, (B, C, N), dtype=jnp.float32)
    params = init_params(kp, C, hidden, out_features)

    # 1) short-sequence path: batch folded into the lane axis, exact erf GELU.
    out = jax.block_until_ready(linear_ffn(x, params))
    ref = linear_ffn_reference(x, params)
    assert out.shape == (B, out_features, N)
    assert jnp.allclose(out, ref, atol=1e-4, rtol=1e-4)

    # 2) lane-dense path: N=384 fits a single token tile per batch element.
    kx2, _ = jax.random.split(kx)
    N2 = 384
    x2 = jax.random.normal(kx2, (B, C, N2), dtype=jnp.float32)
    out2 = jax.block_until_ready(linear_ffn(x2, params))
    ref2 = linear_ffn_reference(x2, params)
    assert out2.shape == (B, out_features, N2)
    assert jnp.allclose(out2, ref2, atol=1e-4, rtol=1e-4)

    # 3) padded multi-tile grid path (forces 256-token tiles -> pad 384 -> 512).
    out3 = jax.block_until_ready(linear_ffn(x2, params, tn_target=256))
    assert jnp.allclose(out3, ref2, atol=1e-4, rtol=1e-4)

    # 4) tanh-approx GELU (EUP) path vs a matching reference.
    out4 = jax.block_until_ready(linear_ffn(x2, params, approximate_gelu=True))
    ref4 = linear_ffn_reference(x2, params, approximate_gelu=True)
    assert jnp.allclose(out4, ref4, atol=1e-4, rtol=1e-4)

    # 5) bf16 MXU-input fast path (v6e/v7x); loose tolerance vs the f32 reference.
    out5 = jax.block_until_ready(linear_ffn(x2, params, use_bf16_matmul=True))
    assert jnp.allclose(out5, ref2, atol=1e-1, rtol=1e-1)

    print("KERNEL_OK")
</pallas_src>

<mosaic_0001>
module attributes {stable_mosaic.version = 11 : i64} {
  func.func @_linear_ffn_kernel(%arg0: i32, %arg1: i32, %arg2: memref<1x16x16xf32, #tpu.memory_space<vmem>>, %arg3: memref<32x16xf32, #tpu.memory_space<vmem>>, %arg4: memref<32x3xf32, #tpu.memory_space<vmem>>, %arg5: memref<16x32xf32, #tpu.memory_space<vmem>>, %arg6: memref<16x3xf32, #tpu.memory_space<vmem>>, %arg7: memref<1x16x16xf32, #tpu.memory_space<vmem>>) attributes {dimension_semantics = [#tpu.dimension_semantics<parallel>, #tpu.dimension_semantics<parallel>], iteration_bounds = array<i64: 1, 1>, scalar_prefetch = 0 : i64, scratch_operands = 0 : i64, tpu.core_type = #tpu.core_type<tc>, window_params = [{transform_indices = @transform_0, window_bounds = array<i64: 1, 16, 16>}, {pipeline_mode = #tpu.pipeline_mode<synchronous>, transform_indices = @transform_1, window_bounds = array<i64: 32, 16>}, {pipeline_mode = #tpu.pipeline_mode<synchronous>, transform_indices = @transform_2, window_bounds = array<i64: 32, 3>}, {pipeline_mode = #tpu.pipeline_mode<synchronous>, transform_indices = @transform_3, window_bounds = array<i64: 16, 32>}, {pipeline_mode = #tpu.pipeline_mode<synchronous>, transform_indices = @transform_4, window_bounds = array<i64: 16, 3>}, {transform_indices = @transform_5, window_bounds = array<i64: 1, 16, 16>}]} {
    %c0 = arith.constant 0 : index
    %c0_0 = arith.constant 0 : index
    %c0_1 = arith.constant 0 : index
    %0 = vector.load %arg2[%c0, %c0_0, %c0_1] : memref<1x16x16xf32, #tpu.memory_space<vmem>>, vector<1x16x16xf32>
    %1 = vector.shape_cast %0 : vector<1x16x16xf32> to vector<16x16xf32>
    %c0_2 = arith.constant 0 : index
    %c0_3 = arith.constant 0 : index
    %2 = vector.load %arg4[%c0_2, %c0_3] : memref<32x3xf32, #tpu.memory_space<vmem>>, vector<32x1xf32>
    %c0_4 = arith.constant 0 : index
    %c1 = arith.constant 1 : index
    %3 = vector.load %arg4[%c0_4, %c1] : memref<32x3xf32, #tpu.memory_space<vmem>>, vector<32x1xf32>
    %c0_5 = arith.constant 0 : index
    %c2 = arith.constant 2 : index
    %4 = vector.load %arg4[%c0_5, %c2] : memref<32x3xf32, #tpu.memory_space<vmem>>, vector<32x1xf32>
    %c0_6 = arith.constant 0 : index
    %c0_7 = arith.constant 0 : index
    %5 = vector.load %arg6[%c0_6, %c0_7] : memref<16x3xf32, #tpu.memory_space<vmem>>, vector<16x1xf32>
    %c0_8 = arith.constant 0 : index
    %c1_9 = arith.constant 1 : index
    %6 = vector.load %arg6[%c0_8, %c1_9] : memref<16x3xf32, #tpu.memory_space<vmem>>, vector<16x1xf32>
    %c0_10 = arith.constant 0 : index
    %c2_11 = arith.constant 2 : index
    %7 = vector.load %arg6[%c0_10, %c2_11] : memref<16x3xf32, #tpu.memory_space<vmem>>, vector<16x1xf32>
    %c0_12 = arith.constant 0 : index
    %c0_13 = arith.constant 0 : index
    %8 = vector.load %arg3[%c0_12, %c0_13] : memref<32x16xf32, #tpu.memory_space<vmem>>, vector<32x16xf32>
    %cst = arith.constant dense<0.000000e+00> : vector<32x16xf32>
    %9 = tpu.matmul %8, %1, %cst {dimension_numbers = #tpu.dot_dimension_numbers<[1], [0], [0], [1], [0, 0, 1, 1], [], []>} : vector<32x16xf32>, vector<16x16xf32>, vector<32x16xf32> -> vector<32x16xf32>
    %10 = vector.broadcast %2 : vector<32x1xf32> to vector<32x16xf32>
    %11 = arith.addf %9, %10 : vector<32x16xf32>
    %cst_14 = arith.constant dense<0.000000e+00> : vector<16xf32>
    %12 = vector.multi_reduction <add>, %11, %cst_14 [0] : vector<32x16xf32> to vector<16xf32>
    %13 = vector.shape_cast %12 : vector<16xf32> to vector<1x16xf32>
    %cst_15 = arith.constant 3.200000e+01 : f32
    %14 = vector.broadcast %cst_15 : f32 to vector<1x16xf32>
    %15 = arith.divf %13, %14 : vector<1x16xf32>
    %16 = vector.broadcast %15 : vector<1x16xf32> to vector<32x16xf32>
    %17 = arith.subf %11, %16 : vector<32x16xf32>
    %18 = arith.mulf %17, %17 : vector<32x16xf32>
    %cst_16 = arith.constant dense<0.000000e+00> : vector<16xf32>
    %19 = vector.multi_reduction <add>, %18, %cst_16 [0] : vector<32x16xf32> to vector<16xf32>
    %20 = vector.shape_cast %19 : vector<16xf32> to vector<1x16xf32>
    %cst_17 = arith.constant 3.200000e+01 : f32
    %21 = vector.broadcast %cst_17 : f32 to vector<1x16xf32>
    %22 = arith.divf %20, %21 : vector<1x16xf32>
    %cst_18 = arith.constant 9.99999974E-6 : f32
    %23 = vector.broadcast %cst_18 : f32 to vector<1x16xf32>
    %24 = arith.addf %22, %23 : vector<1x16xf32>
    %25 = math.rsqrt %24 : vector<1x16xf32>
    %26 = vector.broadcast %25 : vector<1x16xf32> to vector<32x16xf32>
    %27 = arith.mulf %17, %26 : vector<32x16xf32>
    %28 = vector.broadcast %3 : vector<32x1xf32> to vector<32x16xf32>
    %29 = arith.mulf %27, %28 : vector<32x16xf32>
    %30 = vector.broadcast %4 : vector<32x1xf32> to vector<32x16xf32>
    %31 = arith.addf %29, %30 : vector<32x16xf32>
    %cst_19 = arith.constant 5.000000e-01 : f32
    %32 = vector.broadcast %cst_19 : f32 to vector<32x16xf32>
    %33 = arith.mulf %32, %31 : vector<32x16xf32>
    %cst_20 = arith.constant 0.707106769 : f32
    %34 = vector.broadcast %cst_20 : f32 to vector<32x16xf32>
    %35 = arith.mulf %31, %34 : vector<32x16xf32>
    %36 = math.erf %35 : vector<32x16xf32>
    %cst_21 = arith.constant 1.000000e+00 : f32
    %37 = vector.broadcast %cst_21 : f32 to vector<32x16xf32>
    %38 = arith.addf %37, %36 : vector<32x16xf32>
    %39 = arith.mulf %33, %38 : vector<32x16xf32>
    %c0_22 = arith.constant 0 : index
    %c0_23 = arith.constant 0 : index
    %40 = vector.load %arg5[%c0_22, %c0_23] : memref<16x32xf32, #tpu.memory_space<vmem>>, vector<16x32xf32>
    %cst_24 = arith.constant dense<0.000000e+00> : vector<16x16xf32>
    %41 = tpu.matmul %40, %39, %cst_24 {dimension_numbers = #tpu.dot_dimension_numbers<[1], [0], [0], [1], [0, 0, 1, 1], [], []>} : vector<16x32xf32>, vector<32x16xf32>, vector<16x16xf32> -> vector<16x16xf32>
    %42 = vector.broadcast %5 : vector<16x1xf32> to vector<16x16xf32>
    %43 = arith.addf %41, %42 : vector<16x16xf32>
    %cst_25 = arith.constant dense<0.000000e+00> : vector<16xf32>
    %44 = vector.multi_reduction <add>, %43, %cst_25 [0] : vector<16x16xf32> to vector<16xf32>
    %45 = vector.shape_cast %44 : vector<16xf32> to vector<1x16xf32>
    %cst_26 = arith.constant 1.600000e+01 : f32
    %46 = vector.broadcast %cst_26 : f32 to vector<1x16xf32>
    %47 = arith.divf %45, %46 : vector<1x16xf32>
    %48 = vector.broadcast %47 : vector<1x16xf32> to vector<16x16xf32>
    %49 = arith.subf %43, %48 : vector<16x16xf32>
    %50 = arith.mulf %49, %49 : vector<16x16xf32>
    %cst_27 = arith.constant dense<0.000000e+00> : vector<16xf32>
    %51 = vector.multi_reduction <add>, %50, %cst_27 [0] : vector<16x16xf32> to vector<16xf32>
    %52 = vector.shape_cast %51 : vector<16xf32> to vector<1x16xf32>
    %cst_28 = arith.constant 1.600000e+01 : f32
    %53 = vector.broadcast %cst_28 : f32 to vector<1x16xf32>
    %54 = arith.divf %52, %53 : vector<1x16xf32>
    %cst_29 = arith.constant 9.99999974E-6 : f32
    %55 = vector.broadcast %cst_29 : f32 to vector<1x16xf32>
    %56 = arith.addf %54, %55 : vector<1x16xf32>
    %57 = math.rsqrt %56 : vector<1x16xf32>
    %58 = vector.broadcast %57 : vector<1x16xf32> to vector<16x16xf32>
    %59 = arith.mulf %49, %58 : vector<16x16xf32>
    %60 = vector.broadcast %6 : vector<16x1xf32> to vector<16x16xf32>
    %61 = arith.mulf %59, %60 : vector<16x16xf32>
    %62 = vector.broadcast %7 : vector<16x1xf32> to vector<16x16xf32>
    %63 = arith.addf %61, %62 : vector<16x16xf32>
    %cst_30 = arith.constant 5.000000e-01 : f32
    %64 = vector.broadcast %cst_30 : f32 to vector<16x16xf32>
    %65 = arith.mulf %64, %63 : vector<16x16xf32>
    %cst_31 = arith.constant 0.707106769 : f32
    %66 = vector.broadcast %cst_31 : f32 to vector<16x16xf32>
    %67 = arith.mulf %63, %66 : vector<16x16xf32>
    %68 = math.erf %67 : vector<16x16xf32>
    %cst_32 = arith.constant 1.000000e+00 : f32
    %69 = vector.broadcast %cst_32 : f32 to vector<16x16xf32>
    %70 = arith.addf %69, %68 : vector<16x16xf32>
    %71 = arith.mulf %65, %70 : vector<16x16xf32>
    %c0_33 = arith.constant 0 : index
    %c0_34 = arith.constant 0 : index
    %c0_35 = arith.constant 0 : index
    %72 = vector.load %arg7[%c0_33, %c0_34, %c0_35] : memref<1x16x16xf32, #tpu.memory_space<vmem>>, vector<1x16x16xf32>
    %73 = vector.shape_cast %72 : vector<1x16x16xf32> to vector<16x16xf32>
    %74 = vector.shape_cast %71 : vector<16x16xf32> to vector<1x16x16xf32>
    tpu.vector_store %arg7[%c0_33, %c0_34, %c0_35], %74 {strides = array<i32>} : memref<1x16x16xf32, #tpu.memory_space<vmem>>, vector<1x16x16xf32>,
    return
  }
  func.func @transform_0(%arg0: i32, %arg1: i32) -> (i32, i32, i32) {
    %c0_i32 = arith.constant 0 : i32
    %c0_i32_0 = arith.constant 0 : i32
    return %arg0, %c0_i32, %arg1 : i32, i32, i32
  }
  func.func @transform_1(%arg0: i32, %arg1: i32) -> (i32, i32) {
    %c0_i32 = arith.constant 0 : i32
    %c0_i32_0 = arith.constant 0 : i32
    %c0_i32_1 = arith.constant 0 : i32
    return %c0_i32, %c0_i32_0 : i32, i32
  }
  func.func @transform_2(%arg0: i32, %arg1: i32) -> (i32, i32) {
    %c0_i32 = arith.constant 0 : i32
    %c0_i32_0 = arith.constant 0 : i32
    %c0_i32_1 = arith.constant 0 : i32
    return %c0_i32, %c0_i32_0 : i32, i32
  }
  func.func @transform_3(%arg0: i32, %arg1: i32) -> (i32, i32) {
    %c0_i32 = arith.constant 0 : i32
    %c0_i32_0 = arith.constant 0 : i32
    %c0_i32_1 = arith.constant 0 : i32
    return %c0_i32, %c0_i32_0 : i32, i32
  }
  func.func @transform_4(%arg0: i32, %arg1: i32) -> (i32, i32) {
    %c0_i32 = arith.constant 0 : i32
    %c0_i32_0 = arith.constant 0 : i32
    %c0_i32_1 = arith.constant 0 : i32
    return %c0_i32, %c0_i32_0 : i32, i32
  }
  func.func @transform_5(%arg0: i32, %arg1: i32) -> (i32, i32, i32) {
    %c0_i32 = arith.constant 0 : i32
    %c0_i32_0 = arith.constant 0 : i32
    return %arg0, %c0_i32, %arg1 : i32, i32, i32
  }
}

module attributes {stable_mosaic.version = 11 : i64} {
  func.func @_linear_ffn_kernel(%arg0: i32, %arg1: i32, %arg2: memref<1x16x16xf32, #tpu.memory_space<vmem>>, %arg3: memref<32x16xf32, #tpu.memory_space<vmem>>, %arg4: memref<32x3xf32, #tpu.memory_space<vmem>>, %arg5: memref<16x32xf32, #tpu.memory_space<vmem>>, %arg6: memref<16x3xf32, #tpu.memory_space<vmem>>, %arg7: memref<1x16x16xf32, #tpu.memory_space<vmem>>) attributes {dimension_semantics = [#tpu.dimension_semantics<parallel>, #tpu.dimension_semantics<parallel>], iteration_bounds = array<i64: 1, 1>, scalar_prefetch = 0 : i64, scratch_operands = 0 : i64, tpu.core_type = #tpu.core_type<tc>, window_params = [{transform_indices = @transform_0, window_bounds = array<i64: 1, 16, 16>}, {pipeline_mode = #tpu.pipeline_mode<synchronous>, transform_indices = @transform_1, window_bounds = array<i64: 32, 16>}, {pipeline_mode = #tpu.pipeline_mode<synchronous>, transform_indices = @transform_2, window_bounds = array<i64: 32, 3>}, {pipeline_mode = #tpu.pipeline_mode<synchronous>, transform_indices = @transform_3, window_bounds = array<i64: 16, 32>}, {pipeline_mode = #tpu.pipeline_mode<synchronous>, transform_indices = @transform_4, window_bounds = array<i64: 16, 3>}, {transform_indices = @transform_5, window_bounds = array<i64: 1, 16, 16>}]} {
    %c0 = arith.constant 0 : index
    %c0_0 = arith.constant 0 : index
    %c0_1 = arith.constant 0 : index
    %0 = vector.load %arg2[%c0, %c0_0, %c0_1] : memref<1x16x16xf32, #tpu.memory_space<vmem>>, vector<1x16x16xf32>
    %1 = vector.shape_cast %0 : vector<1x16x16xf32> to vector<16x16xf32>
    %c0_2 = arith.constant 0 : index
    %c0_3 = arith.constant 0 : index
    %2 = vector.load %arg4[%c0_2, %c0_3] : memref<32x3xf32, #tpu.memory_space<vmem>>, vector<32x1xf32>
    %c0_4 = arith.constant 0 : index
    %c1 = arith.constant 1 : index
    %3 = vector.load %arg4[%c0_4, %c1] : memref<32x3xf32, #tpu.memory_space<vmem>>, vector<32x1xf32>
    %c0_5 = arith.constant 0 : index
    %c2 = arith.constant 2 : index
    %4 = vector.load %arg4[%c0_5, %c2] : memref<32x3xf32, #tpu.memory_space<vmem>>, vector<32x1xf32>
    %c0_6 = arith.constant 0 : index
    %c0_7 = arith.constant 0 : index
    %5 = vector.load %arg6[%c0_6, %c0_7] : memref<16x3xf32, #tpu.memory_space<vmem>>, vector<16x1xf32>
    %c0_8 = arith.constant 0 : index
    %c1_9 = arith.constant 1 : index
    %6 = vector.load %arg6[%c0_8, %c1_9] : memref<16x3xf32, #tpu.memory_space<vmem>>, vector<16x1xf32>
    %c0_10 = arith.constant 0 : index
    %c2_11 = arith.constant 2 : index
    %7 = vector.load %arg6[%c0_10, %c2_11] : memref<16x3xf32, #tpu.memory_space<vmem>>, vector<16x1xf32>
    %c0_12 = arith.constant 0 : index
    %c0_13 = arith.constant 0 : index
    %8 = vector.load %arg3[%c0_12, %c0_13] : memref<32x16xf32, #tpu.memory_space<vmem>>, vector<32x16xf32>
    %cst = arith.constant dense<0.000000e+00> : vector<32x16xf32>
    %9 = tpu.matmul %8, %1, %cst {dimension_numbers = #tpu.dot_dimension_numbers<[1], [0], [0], [1], [0, 0, 1, 1], [], []>} : vector<32x16xf32>, vector<16x16xf32>, vector<32x16xf32> -> vector<32x16xf32>
    %10 = vector.broadcast %2 : vector<32x1xf32> to vector<32x16xf32>
    %11 = arith.addf %9, %10 : vector<32x16xf32>
    %cst_14 = arith.constant dense<0.000000e+00> : vector<16xf32>
    %12 = vector.multi_reduction <add>, %11, %cst_14 [0] : vector<32x16xf32> to vector<16xf32>
    %13 = vector.shape_cast %12 : vector<16xf32> to vector<1x16xf32>
    %cst_15 = arith.constant 3.200000e+01 : f32
    %14 = vector.broadcast %cst_15 : f32 to vector<1x16xf32>
    %15 = arith.divf %13, %14 : vector<1x16xf32>
    %16 = vector.broadcast %15 : vector<1x16xf32> to vector<32x16xf32>
    %17 = arith.subf %11, %16 : vector<32x16xf32>
    %18 = arith.mulf %17, %17 : vector<32x16xf32>
    %cst_16 = arith.constant dense<0.000000e+00> : vector<16xf32>
    %19 = vector.multi_reduction <add>, %18, %cst_16 [0] : vector<32x16xf32> to vector<16xf32>
    %20 = vector.shape_cast %19 : vector<16xf32> to vector<1x16xf32>
    %cst_17 = arith.constant 3.200000e+01 : f32
    %21 = vector.broadcast %cst_17 : f32 to vector<1x16xf32>
    %22 = arith.divf %20, %21 : vector<1x16xf32>
    %cst_18 = arith.constant 9.99999974E-6 : f32
    %23 = vector.broadcast %cst_18 : f32 to vector<1x16xf32>
    %24 = arith.addf %22, %23 : vector<1x16xf32>
    %25 = math.rsqrt %24 : vector<1x16xf32>
    %26 = vector.broadcast %25 : vector<1x16xf32> to vector<32x16xf32>
    %27 = arith.mulf %17, %26 : vector<32x16xf32>
    %28 = vector.broadcast %3 : vector<32x1xf32> to vector<32x16xf32>
    %29 = arith.mulf %27, %28 : vector<32x16xf32>
    %30 = vector.broadcast %4 : vector<32x1xf32> to vector<32x16xf32>
    %31 = arith.addf %29, %30 : vector<32x16xf32>
    %cst_19 = arith.constant 5.000000e-01 : f32
    %32 = vector.broadcast %cst_19 : f32 to vector<32x16xf32>
    %33 = arith.mulf %32, %31 : vector<32x16xf32>
    %cst_20 = arith.constant 0.707106769 : f32
    %34 = vector.broadcast %cst_20 : f32 to vector<32x16xf32>
    %35 = arith.mulf %31, %34 : vector<32x16xf32>
    %36 = math.erf %35 : vector<32x16xf32>
    %cst_21 = arith.constant 1.000000e+00 : f32
    %37 = vector.broadcast %cst_21 : f32 to vector<32x16xf32>
    %38 = arith.addf %37, %36 : vector<32x16xf32>
    %39 = arith.mulf %33, %38 : vector<32x16xf32>
    %c0_22 = arith.constant 0 : index
    %c0_23 = arith.constant 0 : index
    %40 = vector.load %arg5[%c0_22, %c0_23] : memref<16x32xf32, #tpu.memory_space<vmem>>, vector<16x32xf32>
    %cst_24 = arith.constant dense<0.000000e+00> : vector<16x16xf32>
    %41 = tpu.matmul %40, %39, %cst_24 {dimension_numbers = #tpu.dot_dimension_numbers<[1], [0], [0], [1], [0, 0, 1, 1], [], []>} : vector<16x32xf32>, vector<32x16xf32>, vector<16x16xf32> -> vector<16x16xf32>
    %42 = vector.broadcast %5 : vector<16x1xf32> to vector<16x16xf32>
    %43 = arith.addf %41, %42 : vector<16x16xf32>
    %cst_25 = arith.constant dense<0.000000e+00> : vector<16xf32>
    %44 = vector.multi_reduction <add>, %43, %cst_25 [0] : vector<16x16xf32> to vector<16xf32>
    %45 = vector.shape_cast %44 : vector<16xf32> to vector<1x16xf32>
    %cst_26 = arith.constant 1.600000e+01 : f32
    %46 = vector.broadcast %cst_26 : f32 to vector<1x16xf32>
    %47 = arith.divf %45, %46 : vector<1x16xf32>
    %48 = vector.broadcast %47 : vector<1x16xf32> to vector<16x16xf32>
    %49 = arith.subf %43, %48 : vector<16x16xf32>
    %50 = arith.mulf %49, %49 : vector<16x16xf32>
    %cst_27 = arith.constant dense<0.000000e+00> : vector<16xf32>
    %51 = vector.multi_reduction <add>, %50, %cst_27 [0] : vector<16x16xf32> to vector<16xf32>
    %52 = vector.shape_cast %51 : vector<16xf32> to vector<1x16xf32>
    %cst_28 = arith.constant 1.600000e+01 : f32
    %53 = vector.broadcast %cst_28 : f32 to vector<1x16xf32>
    %54 = arith.divf %52, %53 : vector<1x16xf32>
    %cst_29 = arith.constant 9.99999974E-6 : f32
    %55 = vector.broadcast %cst_29 : f32 to vector<1x16xf32>
    %56 = arith.addf %54, %55 : vector<1x16xf32>
    %57 = math.rsqrt %56 : vector<1x16xf32>
    %58 = vector.broadcast %57 : vector<1x16xf32> to vector<16x16xf32>
    %59 = arith.mulf %49, %58 : vector<16x16xf32>
    %60 = vector.broadcast %6 : vector<16x1xf32> to vector<16x16xf32>
    %61 = arith.mulf %59, %60 : vector<16x16xf32>
    %62 = vector.broadcast %7 : vector<16x1xf32> to vector<16x16xf32>
    %63 = arith.addf %61, %62 : vector<16x16xf32>
    %cst_30 = arith.constant 5.000000e-01 : f32
    %64 = vector.broadcast %cst_30 : f32 to vector<16x16xf32>
    %65 = arith.mulf %64, %63 : vector<16x16xf32>
    %cst_31 = arith.constant 0.707106769 : f32
    %66 = vector.broadcast %cst_31 : f32 to vector<16x16xf32>
    %67 = arith.mulf %63, %66 : vector<16x16xf32>
    %68 = math.erf %67 : vector<16x16xf32>
    %cst_32 = arith.constant 1.000000e+00 : f32
    %69 = vector.broadcast %cst_32 : f32 to vector<16x16xf32>
    %70 = arith.addf %69, %68 : vector<16x16xf32>
    %71 = arith.mulf %65, %70 : vector<16x16xf32>
    %c0_33 = arith.constant 0 : index
    %c0_34 = arith.constant 0 : index
    %c0_35 = arith.constant 0 : index
    %72 = vector.load %arg7[%c0_33, %c0_34, %c0_35] : memref<1x16x16xf32, #tpu.memory_space<vmem>>, vector<1x16x16xf32>
    %73 = vector.shape_cast %72 : vector<1x16x16xf32> to vector<16x16xf32>
    %74 = vector.shape_cast %71 : vector<16x16xf32> to vector<1x16x16xf32>
    tpu.vector_store %arg7[%c0_33, %c0_34, %c0_35], %74 {strides = array<i32>} : memref<1x16x16xf32, #tpu.memory_space<vmem>>, vector<1x16x16xf32>,
    return
  }
  func.func @transform_0(%arg0: i32, %arg1: i32) -> (i32, i32, i32) {
    %c0_i32 = arith.constant 0 : i32
    %c0_i32_0 = arith.constant 0 : i32
    return %arg0, %c0_i32, %arg1 : i32, i32, i32
  }
  func.func @transform_1(%arg0: i32, %arg1: i32) -> (i32, i32) {
    %c0_i32 = arith.constant 0 : i32
    %c0_i32_0 = arith.constant 0 : i32
    %c0_i32_1 = arith.constant 0 : i32
    return %c0_i32, %c0_i32_0 : i32, i32
  }
  func.func @transform_2(%arg0: i32, %arg1: i32) -> (i32, i32) {
    %c0_i32 = arith.constant 0 : i32
    %c0_i32_0 = arith.constant 0 : i32
    %c0_i32_1 = arith.constant 0 : i32
    return %c0_i32, %c0_i32_0 : i32, i32
  }
  func.func @transform_3(%arg0: i32, %arg1: i32) -> (i32, i32) {
    %c0_i32 = arith.constant 0 : i32
    %c0_i32_0 = arith.constant 0 : i32
    %c0_i32_1 = arith.constant 0 : i32
    return %c0_i32, %c0_i32_0 : i32, i32
  }
  func.func @transform_4(%arg0: i32, %arg1: i32) -> (i32, i32) {
    %c0_i32 = arith.constant 0 : i32
    %c0_i32_0 = arith.constant 0 : i32
    %c0_i32_1 = arith.constant 0 : i32
    return %c0_i32, %c0_i32_0 : i32, i32
  }
  func.func @transform_5(%arg0: i32, %arg1: i32) -> (i32, i32, i32) {
    %c0_i32 = arith.constant 0 : i32
    %c0_i32_0 = arith.constant 0 : i32
    return %arg0, %c0_i32, %arg1 : i32, i32, i32
  }
}

</mosaic_0001>

<bundles_post_ra>
// kernel: tpu_custom_call.1
= control target key start
LH: loop header
LB: loop body
LE: loop exit
PB: predicated region body
PF: predicated region fallthrough
CT: control target
= control target key end

     0   :  { %vm53_vm0 = vcmask 130048   ;;  %v519_v4 = vmov 0   ;;  %s620_s0 = inlined_call_operand.vmem [shape: f32[1,16,16], index: 0, kind: input, shape index: {}]   ;;  %s621_s1 = inlined_call_operand.vmem [shape: f32[32,16], index: 1, kind: input, shape index: {}]   ;;  %s622_s2 = inlined_call_operand.vmem [shape: f32[32,3], index: 2, kind: input, shape index: {}]   ;;  %s623_s3 = inlined_call_operand.vmem [shape: f32[16,32], index: 3, kind: input, shape index: {}]   ;;  %s624_s4 = inlined_call_operand.vmem [shape: f32[16,3], index: 4, kind: input, shape index: {}]   ;;  %s625_s5 = inlined_call_operand.hbm [shape: f32[1,16,16], index: 5, kind: output, shape index: {}]  }
   0x1   :  { %v22_v0 = vld [vmem:[%s620_s0 + $0x8] sm:$0xff]  ;;  %v21_v1 = vld [vmem:[%s620_s0] sm:$0xff]  ;;  %470 = vset.pattern.permute.xlu0 %v519_v4  ;;  %v25_v6 = vld [vmem:[%s622_s2 + $0x10] sm:$0xff] }
   0x2   :  { %v29_v2 = vld [vmem:[%s621_s1] sm:$0xff]  ;;  %443 = vmatprep.subr.mxu0 %v22_v0  ;;  %v30_v3 = vld [vmem:[%s621_s1 + $0x8] sm:$0xff]  ;;  %v31_v7 = vld [vmem:[%s621_s1 + $0x10] sm:$0xff] }
   0x3   :  { %447 = vmatprep.mubr.msk.f32.mxu0 %vm53_vm0, %v29_v2  ;;  %444 = vmatpush3.msra.mxu0 %v22_v0  ;;  %v23_v5 = vld [vmem:[%s622_s2] sm:$0xff] }
   0x4   :  { %445 = vmatprep.subr.mxu0 %v21_v1  ;;  %35 = vperm.xlu0 %470, %v23_v5  }
   0x5   :  { %10 = vsyncpa [#allocation3], 0  ;;  %446 = vmatpush3.msra.mxu0 %v21_v1  ;;  %471 = vset.pattern.permute.xlu1 %v519_v4  ;;  %v24_v8 = vld [vmem:[%s622_s2 + $0x8] sm:$0xff]  ;;  %v32_v9 = vld [vmem:[%s621_s1 + $0x18] sm:$0xff]  ;;  %v520_v11 = vmov 1   ;;  %v521_v12 = vmov 2  }
   0x6   :  { %448 = vmatmul.mubr.msk.f32.vlgmr.msra.gmra.mxu0 %vm53_vm0, %v30_v3  ;;  %45 = vperm.xlu1 %471, %v25_v6   ;;  %v26_v10 = vld [vmem:[%s622_s2 + $0x18] sm:$0xff]  ;;  %v254_v13 = vld [vmem:[%s623_s3] sm:$0xff]  ;;  %vm266_vm1 = vcmask 261120   ;;  %v28_v15 = vld [vmem:[%s624_s4 + $0x8] sm:$0xff] }
   0x7   :  { %450 = vmatprep.mubr.msk.f32.mxu0 %vm53_vm0, %v31_v7  ;;  %461 = vmatprep.mubr.msk.f32.mxu1 %vm266_vm1, %v254_v13  ;;  %v27_v14 = vld [vmem:[%s624_s4] sm:$0xff] }
   0x8   :  { %40 = vperm.xlu0 %470, %v24_v8  }
   0xa   :  { %451 = vmatmul.mubr.msk.f32.gmra.mxu0 %vm53_vm0, %v32_v9  ;;  %50 = vperm.xlu1 %471, %v26_v10  }
   0xc   :  { %472 = vset.pattern.permute.xlu0 %v520_v11 }
   0xd   :  { %207 = vperm.xlu0 %472, %v26_v10  }
   0xe   :  { %473 = vset.pattern.permute.xlu1 %v520_v11 }
   0xf   :  { %203 = vperm.xlu1 %473, %v25_v6  }
  0x11   :  { %199 = vperm.xlu0 %472, %v24_v8  }
  0x13   :  { %474 = vset.pattern.permute.xlu1 %v521_v12 }
  0x14   :  { %227 = vperm.xlu1 %474, %v26_v10  }
  0x15   :  { %195 = vperm.xlu0 %472, %v23_v5  }
  0x18   :  { %223 = vperm.xlu1 %474, %v25_v6  }
  0x19   :  { %475 = vset.pattern.permute.xlu0 %v521_v12 }
  0x1a   :  { %215 = vperm.xlu0 %475, %v23_v5  }
  0x1c   :  { %219 = vperm.xlu1 %474, %v24_v8  }
  0x1e   :  { %477 = vset.pattern.permute.xlu0 %v520_v11 }
  0x1f   :  { %378 = vperm.xlu0 %477, %v27_v14  }
  0x20   :  { %476 = vset.pattern.permute.xlu1 %v519_v4 }
  0x21   :  { %258 = vperm.xlu1 %476, %v27_v14  }
  0x23   :  { %480 = vset.pattern.permute.xlu0 %v521_v12 }
  0x24   :  { %392 = vperm.xlu0 %480, %v28_v15  }
  0x25   :  { %263 = vperm.xlu1 %476, %v28_v15  }
  0x29   :  { %478 = vset.pattern.permute.xlu1 %v520_v11 }
  0x2a   :  { %382 = vperm.xlu1 %478, %v28_v15  }
  0x2e   :  { %479 = vset.pattern.permute.xlu1 %v521_v12 }
  0x2f   :  { %388 = vperm.xlu1 %479, %v27_v14  }
  0x7f   :  { %v36_v16 = vpop.permute.xlu0 %35 }
  0x81   :  { %v46_v17 = vpop.permute.xlu1 %45 }
  0x83   :  { %v41_v18 = vpop.permute.xlu0 %40 }
  0x85   :  { %v51_v23 = vpop.permute.xlu1 %50 }
  0x88   :  { %v208_v2 = vpop.permute.xlu0 %207 }
  0x8a   :  { %v204_v1 = vpop.permute.xlu1 %203 }
  0x8c   :  { %v200_v4 = vpop.permute.xlu0 %199 }
  0x8f   :  { %v228_v3 = vpop.permute.xlu1 %227 }
  0x90   :  { %v196_v6 = vpop.permute.xlu0 %195 }
  0x93   :  { %v224_v5 = vpop.permute.xlu1 %223 }
  0x95   :  { %v216_v12 = vpop.permute.xlu0 %215 }
  0xc6   :  { %v449_v19 = vpop.f32.mrf.mxu0 }
  0xc7   :  { %v138_v21 = vadd.f32 %v449_v19, %v41_v18 }
  0xc8   :  { %v132_v20 = vpop.f32.mrf.mxu0 }
  0xc9   :  { %v133_v22 = vadd.f32 %v132_v20, %v36_v16  ;;  %v152_v27 = vsel %vm53_vm0, %v138_v21, 0.0 }
  0xca   :  { %v452_v24 = vpop.f32.mrf.mxu0 }
  0xcb   :  { %v151_v25 = vsel %vm53_vm0, %v133_v22, 0.0  ;;  %v148_v28 = vadd.f32 %v452_v24, %v51_v23 }
  0xcc   :  { %v142_v26 = vpop.f32.mrf.mxu0  ;;  %v153_v30 = vadd.f32 %v152_v27, %v151_v25 }
  0xcd   :  { %v143_v29 = vadd.f32 %v142_v26, %v46_v17  ;;  %v156_v33 = vsel %vm53_vm0, %v148_v28, 0.0  ;;  %v220_v17 = vpop.permute.xlu1 %219 }
  0xcf   :  { %v154_v31 = vsel %vm53_vm0, %v143_v29, 0.0 }
  0xd0   :  { %v155_v32 = vadd.f32 %v154_v31, %v153_v30 }
  0xd2   :  { %v157_v34 = vadd.f32 %v156_v33, %v155_v32 }
  0xd4   :  { %v158_v35 = vrot.slane %v157_v34, 4 }
  0xd6   :  { %v159_v36 = vadd.f32 %v158_v35, %v157_v34 }
  0xd8   :  { %v160_v37 = vrot.slane %v159_v36, 2 }
  0xda   :  { %v161_v38 = vadd.f32 %v160_v37, %v159_v36 }
  0xdc   :  { %v162_v39 = vrot.slane %v161_v38, 1 }
  0xde   :  { %v163_v40 = vadd.f32 %v162_v39, %v161_v38 }
  0xe0   :  { %v165_v41 = vmul.f32 0.03125, %v163_v40 }
  0xe2   :  { %v166_v42 = vsub.f32 %v133_v22, %v165_v41  ;;  %v167_v43 = vsub.f32 %v138_v21, %v165_v41  ;;  %v168_v44 = vsub.f32 %v143_v29, %v165_v41  ;;  %v169_v45 = vsub.f32 %v148_v28, %v165_v41 }
  0xe4   :  { %v170_v46 = vmul.f32 %v166_v42, %v166_v42  ;;  %v171_v47 = vmul.f32 %v167_v43, %v167_v43  ;;  %v172_v48 = vmul.f32 %v168_v44, %v168_v44  ;;  %v173_v49 = vmul.f32 %v169_v45, %v169_v45 }
  0xe6   :  { %v174_v50 = vsel %vm53_vm0, %v170_v46, 0.0  ;;  %v175_v51 = vsel %vm53_vm0, %v171_v47, 0.0  ;;  %v177_v53 = vsel %vm53_vm0, %v172_v48, 0.0  ;;  %v179_v55 = vsel %vm53_vm0, %v173_v49, 0.0 }
  0xe7   :  { %v176_v52 = vadd.f32 %v175_v51, %v174_v50 }
  0xe9   :  { %v178_v54 = vadd.f32 %v177_v53, %v176_v52 }
  0xeb   :  { %v180_v56 = vadd.f32 %v179_v55, %v178_v54 }
  0xed   :  { %v181_v57 = vrot.slane %v180_v56, 4 }
  0xef   :  { %v182_v58 = vadd.f32 %v181_v57, %v180_v56 }
  0xf1   :  { %v183_v59 = vrot.slane %v182_v58, 2 }
  0xf3   :  { %v184_v60 = vadd.f32 %v183_v59, %v182_v58 }
  0xf5   :  { %v185_v61 = vrot.slane %v184_v60, 1 }
  0xf7   :  { %v186_v62 = vadd.f32 %v185_v61, %v184_v60 }
  0xf9   :  { %v187_v63 = vmul.f32 0.03125, %v186_v62 }
  0xfb   :  { %v188_v0 = vadd.f32 1e-05, %v187_v63 }
  0xfd   :  { %481 = vrsqrt.f32 %v188_v0 }
 0x10a   :  { %v482_v7 = vpop.eup %481 }
 0x10b   :  { %v192_v8 = vmul.f32 %v482_v7, %v168_v44  ;;  %v193_v9 = vmul.f32 %v482_v7, %v169_v45  ;;  %v191_v10 = vmul.f32 %v482_v7, %v167_v43  ;;  %v190_v11 = vmul.f32 %v482_v7, %v166_v42  ;;  %v255_v42 = vld [vmem:[%s623_s3 + $0x8] sm:$0xff]  ;;  %v259_v43 = vpop.permute.xlu1 %258  ;;  %s522_s3 = smov [#allocation2]  }
 0x10c   :  { %s414_s17 = sshll.u32 %s522_s3, 4  ;;  %s415_s17 = int_to_ptr.vmem [resolvable:$true] %s414_s17 }
 0x10d   :  { %v212_v13 = vmul.f32 %v204_v1, %v192_v8  ;;  %v213_v14 = vmul.f32 %v208_v2, %v193_v9  ;;  %v211_v15 = vmul.f32 %v200_v4, %v191_v10  ;;  %v210_v16 = vmul.f32 %v196_v6, %v190_v11  ;;  %v379_v11 = vpop.permute.xlu0 %378  ;;  %s497_s18 = scalar_lea.vmem %s415_s17, 256  ;;  %p502_p1 = scmp.lt.s32.totalorder %s415_s17, %s415_s17 }
 0x10e   :  { %p498_p0 = scmp.ne.s32.totalorder %s415_s17, %s497_s18  ;;  %p503_p2 = scmp.lt.s32.totalorder %s497_s18, %s497_s18 }
 0x10f   :  { %v233_v18 = vadd.f32 %v228_v3, %v213_v14  ;;  %v232_v19 = vadd.f32 %v224_v5, %v212_v13  ;;  %v231_v20 = vadd.f32 %v220_v17, %v211_v15  ;;  %v230_v21 = vadd.f32 %v216_v12, %v210_v16  ;;  %v264_v44 = vpop.permute.xlu1 %263 }
 0x110   :  { %p504_p3 = por %p503_p2, %p502_p1 }
 0x111   :  { %v241_v22 = vmul.f32 0.70710677, %v233_v18  ;;  %v240_v23 = vmul.f32 0.70710677, %v232_v19  ;;  %v239_v24 = vmul.f32 0.70710677, %v231_v20  ;;  %v393_v16 = vpop.permute.xlu0 %392 }
 0x112   :  { %v238_v25 = vmul.f32 0.70710677, %v230_v21  ;;  %v237_v28 = vmul.f32 0.5, %v233_v18  ;;  %v236_v33 = vmul.f32 0.5, %v232_v19  ;;  %v235_v36 = vmul.f32 0.5, %v231_v20  ;;  %p505_p4 = pnand %p504_p3, %p498_p0 }
 0x113   :  { %483 = verf.f32 %v241_v22  ;;  %v234_v39 = vmul.f32 0.5, %v230_v21  ;;  %v383_v10 = vpop.permute.xlu1 %382 }
 0x114   :  { %485 = verf.f32 %v240_v23 }
 0x115   :  { %487 = verf.f32 %v239_v24 }
 0x116   :  { %489 = verf.f32 %v238_v25 }
 0x117   :  { %v389_v15 = vpop.permute.xlu1 %388 }
 0x120   :  { %v484_v26 = vpop.eup %483 }
 0x121   :  { %v486_v27 = vpop.eup %485  ;;  %v249_v29 = vadd.f32 1.0, %v484_v26 }
 0x122   :  { %v488_v30 = vpop.eup %487  ;;  %v248_v31 = vadd.f32 1.0, %v486_v27 }
 0x123   :  { %v490_v32 = vpop.eup %489  ;;  %v253_v34 = vmul.f32 %v249_v29, %v237_v28  ;;  %v247_v35 = vadd.f32 1.0, %v488_v30 }
 0x124   :  { %v252_v37 = vmul.f32 %v248_v31, %v236_v33  ;;  %v246_v38 = vadd.f32 1.0, %v490_v32 }
 0x125   :  { %453 = vmatprep.subr.mxu1 %v253_v34  ;;  %v251_v40 = vmul.f32 %v247_v35, %v235_v36 }
 0x126   :  { %454 = vmatpush3.msra.mxu1 %v253_v34  ;;  %v250_v41 = vmul.f32 %v246_v38, %v234_v39 }
 0x127   :  { %455 = vmatprep.subr.mxu1 %v252_v37 }
 0x128   :  { %456 = vmatpush3.msra.mxu1 %v252_v37 }
 0x129   :  { %457 = vmatprep.subr.mxu1 %v251_v40 }
 0x12a   :  { %458 = vmatpush3.msra.mxu1 %v251_v40 }
 0x12b   :  { %459 = vmatprep.subr.mxu1 %v250_v41 }
 0x12c   :  { %460 = vmatpush3.msra.mxu1 %v250_v41 }
 0x12d   :  { %462 = vmatmul.mubr.msk.f32.vlgmr.msra.gmra.mxu1 %vm266_vm1, %v255_v42 }
 0x1ed   :  { %v463_v45 = vpop.f32.mrf.mxu1 }
 0x1ee   :  { %v345_v46 = vadd.f32 %v463_v45, %v264_v44 }
 0x1ef   :  { %v339_v47 = vpop.f32.mrf.mxu1 }
 0x1f0   :  { %v340_v48 = vadd.f32 %v339_v47, %v259_v43  ;;  %v349_v49 = vsel %vm53_vm0, %v345_v46, 0.0 }
 0x1f2   :  { %v348_v50 = vsel %vm53_vm0, %v340_v48, 0.0 }
 0x1f3   :  { %v350_v51 = vadd.f32 %v349_v49, %v348_v50 }
 0x1f5   :  { %v351_v52 = vrot.slane %v350_v51, 4 }
 0x1f7   :  { %v352_v53 = vadd.f32 %v351_v52, %v350_v51 }
 0x1f9   :  { %v353_v54 = vrot.slane %v352_v53, 2 }
 0x1fb   :  { %v354_v55 = vadd.f32 %v353_v54, %v352_v53 }
 0x1fd   :  { %v355_v56 = vrot.slane %v354_v55, 1 }
 0x1ff   :  { %v356_v57 = vadd.f32 %v355_v56, %v354_v55 }
 0x201   :  { %v358_v58 = vmul.f32 0.0625, %v356_v57 }
 0x203   :  { %v359_v59 = vsub.f32 %v340_v48, %v358_v58  ;;  %v360_v60 = vsub.f32 %v345_v46, %v358_v58 }
 0x205   :  { %v361_v61 = vmul.f32 %v359_v59, %v359_v59  ;;  %v362_v62 = vmul.f32 %v360_v60, %v360_v60 }
 0x207   :  { %v363_v63 = vsel %vm53_vm0, %v361_v61, 0.0  ;;  %v364_v0 = vsel %vm53_vm0, %v362_v62, 0.0 }
 0x208   :  { %v365_v1 = vadd.f32 %v364_v0, %v363_v63 }
 0x20a   :  { %v366_v2 = vrot.slane %v365_v1, 4 }
 0x20c   :  { %v367_v3 = vadd.f32 %v366_v2, %v365_v1 }
 0x20e   :  { %v368_v4 = vrot.slane %v367_v3, 2 }
 0x210   :  { %v369_v5 = vadd.f32 %v368_v4, %v367_v3 }
 0x212   :  { %v370_v6 = vrot.slane %v369_v5, 1 }
 0x214   :  { %v371_v7 = vadd.f32 %v370_v6, %v369_v5 }
 0x216   :  { %v372_v8 = vmul.f32 0.0625, %v371_v7 }
 0x218   :  { %v373_v9 = vadd.f32 1e-05, %v372_v8 }
 0x21a   :  { %491 = vrsqrt.f32 %v373_v9 }
 0x227   :  { %v492_v12 = vpop.eup %491 }
 0x228   :  { %v376_v13 = vmul.f32 %v492_v12, %v360_v60  ;;  %v375_v14 = vmul.f32 %v492_v12, %v359_v59 }
 0x22a   :  { %v386_v17 = vmul.f32 %v383_v10, %v376_v13  ;;  %v385_v18 = vmul.f32 %v379_v11, %v375_v14 }
 0x22c   :  { %v395_v19 = vadd.f32 %v389_v15, %v385_v18  ;;  %v396_v20 = vadd.f32 %v393_v16, %v386_v17 }
 0x22e   :  { %v399_v21 = vmul.f32 0.70710677, %v395_v19  ;;  %v400_v22 = vmul.f32 0.70710677, %v396_v20  ;;  %v397_v25 = vmul.f32 0.5, %v395_v19  ;;  %v398_v27 = vmul.f32 0.5, %v396_v20 }
 0x230   :  { %493 = verf.f32 %v399_v21 }
 0x231   :  { %495 = verf.f32 %v400_v22 }
 0x23d   :  { %v494_v23 = vpop.eup %493 }
 0x23e   :  { %v496_v24 = vpop.eup %495  ;;  %v403_v26 = vadd.f32 1.0, %v494_v23 }
 0x23f   :  { %v404_v28 = vadd.f32 1.0, %v496_v24 }
 0x240   :  { %v405_v29 = vmul.f32 %v403_v26, %v397_v25 }
 0x241   :  { %v406_v30 = vmul.f32 %v404_v28, %v398_v27 }
 0x242   :  { %407 = vst.msk [vmem:[#allocation2] sm:$0xff] %vm53_vm0, %v405_v29 }
 0x243   :  { %408 = vst.msk [vmem:[#allocation2 + $0x8] sm:$0xff] %vm53_vm0, %v406_v30 }
 0x244   :  { %508 = shalt.err (!%p505_p4)
}
 0x245   :  { %s523_s19 = smov 128   ;;  %s524_s20 = smov 8  }
 0x246   :  { %420 = dma.vmem_to_hbm [thread:$0]  %s415_s17, 256, %s625_s5, [#allocation3], %s523_s19, %s523_s19, %s524_s20  }
 0x247   :  { %517 = dma.done.wait [#allocation3], 256  }
 0x248   :  { %518 = vsyncadd [#allocation3], 4294967040 }
 0x249   :  { %424 = vsyncpa [#allocation3], 1 }

// kernel: tpu_custom_call.1
= control target key start
LH: loop header
LB: loop body
LE: loop exit
PB: predicated region body
PF: predicated region fallthrough
CT: control target
= control target key end

     0   :  { %vm53_vm0 = vcmask 130048   ;;  %v519_v4 = vmov 0   ;;  %s620_s0 = inlined_call_operand.vmem [shape: f32[1,16,16], index: 0, kind: input, shape index: {}]   ;;  %s621_s1 = inlined_call_operand.vmem [shape: f32[32,16], index: 1, kind: input, shape index: {}]   ;;  %s622_s2 = inlined_call_operand.vmem [shape: f32[32,3], index: 2, kind: input, shape index: {}]   ;;  %s623_s3 = inlined_call_operand.vmem [shape: f32[16,32], index: 3, kind: input, shape index: {}]   ;;  %s624_s4 = inlined_call_operand.vmem [shape: f32[16,3], index: 4, kind: input, shape index: {}]   ;;  %s625_s5 = inlined_call_operand.hbm [shape: f32[1,16,16], index: 5, kind: output, shape index: {}]  }
   0x1   :  { %v22_v0 = vld [vmem:[%s620_s0 + $0x8] sm:$0xff]  ;;  %v21_v1 = vld [vmem:[%s620_s0] sm:$0xff]  ;;  %470 = vset.pattern.permute.xlu0 %v519_v4  ;;  %v25_v6 = vld [vmem:[%s622_s2 + $0x10] sm:$0xff] }
   0x2   :  { %v29_v2 = vld [vmem:[%s621_s1] sm:$0xff]  ;;  %443 = vmatprep.subr.mxu0 %v22_v0  ;;  %v30_v3 = vld [vmem:[%s621_s1 + $0x8] sm:$0xff]  ;;  %v31_v7 = vld [vmem:[%s621_s1 + $0x10] sm:$0xff] }
   0x3   :  { %447 = vmatprep.mubr.msk.f32.mxu0 %vm53_vm0, %v29_v2  ;;  %444 = vmatpush3.msra.mxu0 %v22_v0  ;;  %v23_v5 = vld [vmem:[%s622_s2] sm:$0xff] }
   0x4   :  { %445 = vmatprep.subr.mxu0 %v21_v1  ;;  %35 = vperm.xlu0 %470, %v23_v5  }
   0x5   :  { %10 = vsyncpa [#allocation3], 0  ;;  %446 = vmatpush3.msra.mxu0 %v21_v1  ;;  %471 = vset.pattern.permute.xlu1 %v519_v4  ;;  %v24_v8 = vld [vmem:[%s622_s2 + $0x8] sm:$0xff]  ;;  %v32_v9 = vld [vmem:[%s621_s1 + $0x18] sm:$0xff]  ;;  %v520_v11 = vmov 1   ;;  %v521_v12 = vmov 2  }
   0x6   :  { %448 = vmatmul.mubr.msk.f32.vlgmr.msra.gmra.mxu0 %vm53_vm0, %v30_v3  ;;  %45 = vperm.xlu1 %471, %v25_v6   ;;  %v26_v10 = vld [vmem:[%s622_s2 + $0x18] sm:$0xff]  ;;  %v254_v13 = vld [vmem:[%s623_s3] sm:$0xff]  ;;  %vm266_vm1 = vcmask 261120   ;;  %v28_v15 = vld [vmem:[%s624_s4 + $0x8] sm:$0xff] }
   0x7   :  { %450 = vmatprep.mubr.msk.f32.mxu0 %vm53_vm0, %v31_v7  ;;  %461 = vmatprep.mubr.msk.f32.mxu1 %vm266_vm1, %v254_v13  ;;  %v27_v14 = vld [vmem:[%s624_s4] sm:$0xff] }
   0x8   :  { %40 = vperm.xlu0 %470, %v24_v8  }
   0xa   :  { %451 = vmatmul.mubr.msk.f32.gmra.mxu0 %vm53_vm0, %v32_v9  ;;  %50 = vperm.xlu1 %471, %v26_v10  }
   0xc   :  { %472 = vset.pattern.permute.xlu0 %v520_v11 }
   0xd   :  { %207 = vperm.xlu0 %472, %v26_v10  }
   0xe   :  { %473 = vset.pattern.permute.xlu1 %v520_v11 }
   0xf   :  { %203 = vperm.xlu1 %473, %v25_v6  }
  0x11   :  { %199 = vperm.xlu0 %472, %v24_v8  }
  0x13   :  { %474 = vset.pattern.permute.xlu1 %v521_v12 }
  0x14   :  { %227 = vperm.xlu1 %474, %v26_v10  }
  0x15   :  { %195 = vperm.xlu0 %472, %v23_v5  }
  0x18   :  { %223 = vperm.xlu1 %474, %v25_v6  }
  0x19   :  { %475 = vset.pattern.permute.xlu0 %v521_v12 }
  0x1a   :  { %215 = vperm.xlu0 %475, %v23_v5  }
  0x1c   :  { %219 = vperm.xlu1 %474, %v24_v8  }
  0x1e   :  { %477 = vset.pattern.permute.xlu0 %v520_v11 }
  0x1f   :  { %378 = vperm.xlu0 %477, %v27_v14  }
  0x20   :  { %476 = vset.pattern.permute.xlu1 %v519_v4 }
  0x21   :  { %258 = vperm.xlu1 %476, %v27_v14  }
  0x23   :  { %480 = vset.pattern.permute.xlu0 %v521_v12 }
  0x24   :  { %392 = vperm.xlu0 %480, %v28_v15  }
  0x25   :  { %263 = vperm.xlu1 %476, %v28_v15  }
  0x29   :  { %478 = vset.pattern.permute.xlu1 %v520_v11 }
  0x2a   :  { %382 = vperm.xlu1 %478, %v28_v15  }
  0x2e   :  { %479 = vset.pattern.permute.xlu1 %v521_v12 }
  0x2f   :  { %388 = vperm.xlu1 %479, %v27_v14  }
  0x7f   :  { %v36_v16 = vpop.permute.xlu0 %35 }
  0x81   :  { %v46_v17 = vpop.permute.xlu1 %45 }
  0x83   :  { %v41_v18 = vpop.permute.xlu0 %40 }
  0x85   :  { %v51_v23 = vpop.permute.xlu1 %50 }
  0x88   :  { %v208_v2 = vpop.permute.xlu0 %207 }
  0x8a   :  { %v204_v1 = vpop.permute.xlu1 %203 }
  0x8c   :  { %v200_v4 = vpop.permute.xlu0 %199 }
  0x8f   :  { %v228_v3 = vpop.permute.xlu1 %227 }
  0x90   :  { %v196_v6 = vpop.permute.xlu0 %195 }
  0x93   :  { %v224_v5 = vpop.permute.xlu1 %223 }
  0x95   :  { %v216_v12 = vpop.permute.xlu0 %215 }
  0xc6   :  { %v449_v19 = vpop.f32.mrf.mxu0 }
  0xc7   :  { %v138_v21 = vadd.f32 %v449_v19, %v41_v18 }
  0xc8   :  { %v132_v20 = vpop.f32.mrf.mxu0 }
  0xc9   :  { %v133_v22 = vadd.f32 %v132_v20, %v36_v16  ;;  %v152_v27 = vsel %vm53_vm0, %v138_v21, 0.0 }
  0xca   :  { %v452_v24 = vpop.f32.mrf.mxu0 }
  0xcb   :  { %v151_v25 = vsel %vm53_vm0, %v133_v22, 0.0  ;;  %v148_v28 = vadd.f32 %v452_v24, %v51_v23 }
  0xcc   :  { %v142_v26 = vpop.f32.mrf.mxu0  ;;  %v153_v30 = vadd.f32 %v152_v27, %v151_v25 }
  0xcd   :  { %v143_v29 = vadd.f32 %v142_v26, %v46_v17  ;;  %v156_v33 = vsel %vm53_vm0, %v148_v28, 0.0  ;;  %v220_v17 = vpop.permute.xlu1 %219 }
  0xcf   :  { %v154_v31 = vsel %vm53_vm0, %v143_v29, 0.0 }
  0xd0   :  { %v155_v32 = vadd.f32 %v154_v31, %v153_v30 }
  0xd2   :  { %v157_v34 = vadd.f32 %v156_v33, %v155_v32 }
  0xd4   :  { %v158_v35 = vrot.slane %v157_v34, 4 }
  0xd6   :  { %v159_v36 = vadd.f32 %v158_v35, %v157_v34 }
  0xd8   :  { %v160_v37 = vrot.slane %v159_v36, 2 }
  0xda   :  { %v161_v38 = vadd.f32 %v160_v37, %v159_v36 }
  0xdc   :  { %v162_v39 = vrot.slane %v161_v38, 1 }
  0xde   :  { %v163_v40 = vadd.f32 %v162_v39, %v161_v38 }
  0xe0   :  { %v165_v41 = vmul.f32 0.03125, %v163_v40 }
  0xe2   :  { %v166_v42 = vsub.f32 %v133_v22, %v165_v41  ;;  %v167_v43 = vsub.f32 %v138_v21, %v165_v41  ;;  %v168_v44 = vsub.f32 %v143_v29, %v165_v41  ;;  %v169_v45 = vsub.f32 %v148_v28, %v165_v41 }
  0xe4   :  { %v170_v46 = vmul.f32 %v166_v42, %v166_v42  ;;  %v171_v47 = vmul.f32 %v167_v43, %v167_v43  ;;  %v172_v48 = vmul.f32 %v168_v44, %v168_v44  ;;  %v173_v49 = vmul.f32 %v169_v45, %v169_v45 }
  0xe6   :  { %v174_v50 = vsel %vm53_vm0, %v170_v46, 0.0  ;;  %v175_v51 = vsel %vm53_vm0, %v171_v47, 0.0  ;;  %v177_v53 = vsel %vm53_vm0, %v172_v48, 0.0  ;;  %v179_v55 = vsel %vm53_vm0, %v173_v49, 0.0 }
  0xe7   :  { %v176_v52 = vadd.f32 %v175_v51, %v174_v50 }
  0xe9   :  { %v178_v54 = vadd.f32 %v177_v53, %v176_v52 }
  0xeb   :  { %v180_v56 = vadd.f32 %v179_v55, %v178_v54 }
  0xed   :  { %v181_v57 = vrot.slane %v180_v56, 4 }
  0xef   :  { %v182_v58 = vadd.f32 %v181_v57, %v180_v56 }
  0xf1   :  { %v183_v59 = vrot.slane %v182_v58, 2 }
  0xf3   :  { %v184_v60 = vadd.f32 %v183_v59, %v182_v58 }
  0xf5   :  { %v185_v61 = vrot.slane %v184_v60, 1 }
  0xf7   :  { %v186_v62 = vadd.f32 %v185_v61, %v184_v60 }
  0xf9   :  { %v187_v63 = vmul.f32 0.03125, %v186_v62 }
  0xfb   :  { %v188_v0 = vadd.f32 1e-05, %v187_v63 }
  0xfd   :  { %481 = vrsqrt.f32 %v188_v0 }
 0x10a   :  { %v482_v7 = vpop.eup %481 }
 0x10b   :  { %v192_v8 = vmul.f32 %v482_v7, %v168_v44  ;;  %v193_v9 = vmul.f32 %v482_v7, %v169_v45  ;;  %v191_v10 = vmul.f32 %v482_v7, %v167_v43  ;;  %v190_v11 = vmul.f32 %v482_v7, %v166_v42  ;;  %v255_v42 = vld [vmem:[%s623_s3 + $0x8] sm:$0xff]  ;;  %v259_v43 = vpop.permute.xlu1 %258  ;;  %s522_s3 = smov [#allocation2]  }
 0x10c   :  { %s414_s17 = sshll.u32 %s522_s3, 4  ;;  %s415_s17 = int_to_ptr.vmem [resolvable:$true] %s414_s17 }
 0x10d   :  { %v212_v13 = vmul.f32 %v204_v1, %v192_v8  ;;  %v213_v14 = vmul.f32 %v208_v2, %v193_v9  ;;  %v211_v15 = vmul.f32 %v200_v4, %v191_v10  ;;  %v210_v16 = vmul.f32 %v196_v6, %v190_v11  ;;  %v379_v11 = vpop.permute.xlu0 %378  ;;  %s497_s18 = scalar_lea.vmem %s415_s17, 256  ;;  %p502_p1 = scmp.lt.s32.totalorder %s415_s17, %s415_s17 }
 0x10e   :  { %p498_p0 = scmp.ne.s32.totalorder %s415_s17, %s497_s18  ;;  %p503_p2 = scmp.lt.s32.totalorder %s497_s18, %s497_s18 }
 0x10f   :  { %v233_v18 = vadd.f32 %v228_v3, %v213_v14  ;;  %v232_v19 = vadd.f32 %v224_v5, %v212_v13  ;;  %v231_v20 = vadd.f32 %v220_v17, %v211_v15  ;;  %v230_v21 = vadd.f32 %v216_v12, %v210_v16  ;;  %v264_v44 = vpop.permute.xlu1 %263 }
 0x110   :  { %p504_p3 = por %p503_p2, %p502_p1 }
 0x111   :  { %v241_v22 = vmul.f32 0.70710677, %v233_v18  ;;  %v240_v23 = vmul.f32 0.70710677, %v232_v19  ;;  %v239_v24 = vmul.f32 0.70710677, %v231_v20  ;;  %v393_v16 = vpop.permute.xlu0 %392 }
 0x112   :  { %v238_v25 = vmul.f32 0.70710677, %v230_v21  ;;  %v237_v28 = vmul.f32 0.5, %v233_v18  ;;  %v236_v33 = vmul.f32 0.5, %v232_v19  ;;  %v235_v36 = vmul.f32 0.5, %v231_v20  ;;  %p505_p4 = pnand %p504_p3, %p498_p0 }
 0x113   :  { %483 = verf.f32 %v241_v22  ;;  %v234_v39 = vmul.f32 0.5, %v230_v21  ;;  %v383_v10 = vpop.permute.xlu1 %382 }
 0x114   :  { %485 = verf.f32 %v240_v23 }
 0x115   :  { %487 = verf.f32 %v239_v24 }
 0x116   :  { %489 = verf.f32 %v238_v25 }
 0x117   :  { %v389_v15 = vpop.permute.xlu1 %388 }
 0x120   :  { %v484_v26 = vpop.eup %483 }
 0x121   :  { %v486_v27 = vpop.eup %485  ;;  %v249_v29 = vadd.f32 1.0, %v484_v26 }
 0x122   :  { %v488_v30 = vpop.eup %487  ;;  %v248_v31 = vadd.f32 1.0, %v486_v27 }
 0x123   :  { %v490_v32 = vpop.eup %489  ;;  %v253_v34 = vmul.f32 %v249_v29, %v237_v28  ;;  %v247_v35 = vadd.f32 1.0, %v488_v30 }
 0x124   :  { %v252_v37 = vmul.f32 %v248_v31, %v236_v33  ;;  %v246_v38 = vadd.f32 1.0, %v490_v32 }
 0x125   :  { %453 = vmatprep.subr.mxu1 %v253_v34  ;;  %v251_v40 = vmul.f32 %v247_v35, %v235_v36 }
 0x126   :  { %454 = vmatpush3.msra.mxu1 %v253_v34  ;;  %v250_v41 = vmul.f32 %v246_v38, %v234_v39 }
 0x127   :  { %455 = vmatprep.subr.mxu1 %v252_v37 }
 0x128   :  { %456 = vmatpush3.msra.mxu1 %v252_v37 }
 0x129   :  { %457 = vmatprep.subr.mxu1 %v251_v40 }
 0x12a   :  { %458 = vmatpush3.msra.mxu1 %v251_v40 }
 0x12b   :  { %459 = vmatprep.subr.mxu1 %v250_v41 }
 0x12c   :  { %460 = vmatpush3.msra.mxu1 %v250_v41 }
 0x12d   :  { %462 = vmatmul.mubr.msk.f32.vlgmr.msra.gmra.mxu1 %vm266_vm1, %v255_v42 }
 0x1ed   :  { %v463_v45 = vpop.f32.mrf.mxu1 }
 0x1ee   :  { %v345_v46 = vadd.f32 %v463_v45, %v264_v44 }
 0x1ef   :  { %v339_v47 = vpop.f32.mrf.mxu1 }
 0x1f0   :  { %v340_v48 = vadd.f32 %v339_v47, %v259_v43  ;;  %v349_v49 = vsel %vm53_vm0, %v345_v46, 0.0 }
 0x1f2   :  { %v348_v50 = vsel %vm53_vm0, %v340_v48, 0.0 }
 0x1f3   :  { %v350_v51 = vadd.f32 %v349_v49, %v348_v50 }
 0x1f5   :  { %v351_v52 = vrot.slane %v350_v51, 4 }
 0x1f7   :  { %v352_v53 = vadd.f32 %v351_v52, %v350_v51 }
 0x1f9   :  { %v353_v54 = vrot.slane %v352_v53, 2 }
 0x1fb   :  { %v354_v55 = vadd.f32 %v353_v54, %v352_v53 }
 0x1fd   :  { %v355_v56 = vrot.slane %v354_v55, 1 }
 0x1ff   :  { %v356_v57 = vadd.f32 %v355_v56, %v354_v55 }
 0x201   :  { %v358_v58 = vmul.f32 0.0625, %v356_v57 }
 0x203   :  { %v359_v59 = vsub.f32 %v340_v48, %v358_v58  ;;  %v360_v60 = vsub.f32 %v345_v46, %v358_v58 }
 0x205   :  { %v361_v61 = vmul.f32 %v359_v59, %v359_v59  ;;  %v362_v62 = vmul.f32 %v360_v60, %v360_v60 }
 0x207   :  { %v363_v63 = vsel %vm53_vm0, %v361_v61, 0.0  ;;  %v364_v0 = vsel %vm53_vm0, %v362_v62, 0.0 }
 0x208   :  { %v365_v1 = vadd.f32 %v364_v0, %v363_v63 }
 0x20a   :  { %v366_v2 = vrot.slane %v365_v1, 4 }
 0x20c   :  { %v367_v3 = vadd.f32 %v366_v2, %v365_v1 }
 0x20e   :  { %v368_v4 = vrot.slane %v367_v3, 2 }
 0x210   :  { %v369_v5 = vadd.f32 %v368_v4, %v367_v3 }
 0x212   :  { %v370_v6 = vrot.slane %v369_v5, 1 }
 0x214   :  { %v371_v7 = vadd.f32 %v370_v6, %v369_v5 }
 0x216   :  { %v372_v8 = vmul.f32 0.0625, %v371_v7 }
 0x218   :  { %v373_v9 = vadd.f32 1e-05, %v372_v8 }
 0x21a   :  { %491 = vrsqrt.f32 %v373_v9 }
 0x227   :  { %v492_v12 = vpop.eup %491 }
 0x228   :  { %v376_v13 = vmul.f32 %v492_v12, %v360_v60  ;;  %v375_v14 = vmul.f32 %v492_v12, %v359_v59 }
 0x22a   :  { %v386_v17 = vmul.f32 %v383_v10, %v376_v13  ;;  %v385_v18 = vmul.f32 %v379_v11, %v375_v14 }
 0x22c   :  { %v395_v19 = vadd.f32 %v389_v15, %v385_v18  ;;  %v396_v20 = vadd.f32 %v393_v16, %v386_v17 }
 0x22e   :  { %v399_v21 = vmul.f32 0.70710677, %v395_v19  ;;  %v400_v22 = vmul.f32 0.70710677, %v396_v20  ;;  %v397_v25 = vmul.f32 0.5, %v395_v19  ;;  %v398_v27 = vmul.f32 0.5, %v396_v20 }
 0x230   :  { %493 = verf.f32 %v399_v21 }
 0x231   :  { %495 = verf.f32 %v400_v22 }
 0x23d   :  { %v494_v23 = vpop.eup %493 }
 0x23e   :  { %v496_v24 = vpop.eup %495  ;;  %v403_v26 = vadd.f32 1.0, %v494_v23 }
 0x23f   :  { %v404_v28 = vadd.f32 1.0, %v496_v24 }
 0x240   :  { %v405_v29 = vmul.f32 %v403_v26, %v397_v25 }
 0x241   :  { %v406_v30 = vmul.f32 %v404_v28, %v398_v27 }
 0x242   :  { %407 = vst.msk [vmem:[#allocation2] sm:$0xff] %vm53_vm0, %v405_v29 }
 0x243   :  { %408 = vst.msk [vmem:[#allocation2 + $0x8] sm:$0xff] %vm53_vm0, %v406_v30 }
 0x244   :  { %508 = shalt.err (!%p505_p4)
}
 0x245   :  { %s523_s19 = smov 128   ;;  %s524_s20 = smov 8  }
 0x246   :  { %420 = dma.vmem_to_hbm [thread:$0]  %s415_s17, 256, %s625_s5, [#allocation3], %s523_s19, %s523_s19, %s524_s20  }
 0x247   :  { %517 = dma.done.wait [#allocation3], 256  }
 0x248   :  { %518 = vsyncadd [#allocation3], 4294967040 }
 0x249   :  { %424 = vsyncpa [#allocation3], 1 }

</bundles_post_ra>
